<compile_context>
chip_gen: v6e
topology: v6e:2x2x1
jax: 0.10.0
libtpu: 0.0.40
codegen_flags: <defaults>
</compile_context>

<pallas_src>
import jax
import jax.numpy as jnp
from jax import lax
from jax.experimental import pallas as pl
from jax.experimental.pallas import tpu as pltpu

LEAKY_SLOPE = 0.01   # args.leaky_relu_slope
KH = KW = 7          # resnet/densenet conv1
STRIDE = 2
PAD = 3


# ----------------------------- Pallas kernel --------------------------------
def fused_model_kernel(patches_ref, wc_ref, w0_ref, w1_ref, out_ref):
    b, e = out_ref.shape
    bp = patches_ref.shape[0]
    p = bp // b

    # encoder conv as a single [B*P, CK] x [CK, Cenc] MXU matmul + ReLU
    # (CK = 196 is not padded in HBM; Mosaic masks the lanes on-chip)
    conv = jnp.dot(patches_ref[...], wc_ref[...],
                   preferred_element_type=jnp.float32)            # [B*P, Cenc]
    conv = jnp.maximum(conv, 0.0)                                 # surrogate encoder ReLU

    # AdaptiveAvgPool2d(1): layout-preserving reshape (P % 8 == 0) + XLU sum
    # over the patch axis; the 1/P mean factor is folded into w0.
    feat = jnp.sum(conv.reshape(b, p, conv.shape[-1]), axis=1)    # [B, Cenc]

    # fused embedding + scaler heads (2 matmuls instead of 4)
    h = jnp.dot(feat, w0_ref[...], preferred_element_type=jnp.float32)    # [B, 2H]
    h = jnp.where(h >= 0, h, LEAKY_SLOPE * h)                             # LeakyReLU
    fused = jnp.dot(h, w1_ref[...], preferred_element_type=jnp.float32)   # [B, E+1]

    emb = fused[:, :e]                                            # [B, E]
    sc_logit = fused[:, e:e + 1]                                  # [B, 1]

    # sigmoid via EUP exp + approx EUP reciprocal, overflow-safe split form:
    #   x >= 0:  1 / (1 + e^-x)        x < 0:  e^x / (1 + e^x)
    z = jnp.exp(-jnp.abs(sc_logit))
    inv_den = pl.reciprocal(1.0 + z, approx=True)
    scaler = jnp.where(sc_logit >= 0, inv_den, z * inv_den)       # [B, 1]

    # L2 normalize via EUP rsqrt (eps avoids inf for an all-zero embedding row)
    inv_norm = lax.rsqrt(jnp.sum(emb * emb, axis=1, keepdims=True) + 1e-12)

    # embedding_norm == 'none' -> normalize_output is identity; single store
    out_ref[...] = emb * inv_norm * scaler


# ------------------------- one-time weight preparation ------------------------
def prepare_params(conv_w, w_emb0, w_emb1, w_sc0, w_sc1, num_patches):
    """Hoisted out of the per-call path: transpose / reshape / fuse the weights."""
    cenc, cin, kh, kw = conv_w.shape
    ck = cin * kh * kw
    # conv weight as [CK, Cenc] matmul operand, rows ordered (cin, kh, kw) to
    # match conv_general_dilated_patches' channel-major patch layout.  No HBM
    # pad of the contraction dim (Mosaic handles the 196-lane K on-chip).
    wc = conv_w.transpose(1, 2, 3, 0).reshape(ck, cenc)

    hemb = w_emb0.shape[0]
    e = w_emb1.shape[0]
    # fused heads: W0 = [F, 2H] (concat of both first layers) scaled by 1/P so
    # the in-kernel pool is a plain sum (mean @ W == sum @ (W / P));
    # W1 = block-diagonal [2H, E+1].
    w0 = jnp.concatenate([w_emb0.T, w_sc0.T], axis=1) / float(num_patches)
    w1 = jnp.zeros((2 * hemb, e + 1), jnp.float32)
    w1 = w1.at[:hemb, :e].set(w_emb1.T)
    w1 = w1.at[hemb:, e:].set(w_sc1.T)
    return wc, w0, w1


# ------------------------------ JAX wrapper ----------------------------------
@jax.jit
def model_forward(x, wc, w0, w1):
    b = x.shape[0]
    e = w1.shape[1] - 1

    # im2col as a single XLA op: [B, OH, OW, Cin*KH*KW], (cin,kh,kw) channel-major
    patches = lax.conv_general_dilated_patches(
        x, (KH, KW), (STRIDE, STRIDE), [(PAD, PAD), (PAD, PAD)],
        dimension_numbers=('NCHW', 'OIHW', 'NHWC'))
    _, oh, ow, ck = patches.shape
    patches2d = patches.reshape(b * oh * ow, ck)                  # [B*P, CK], no pad

    # grid=(): single invocation, whole-array operands resident in VMEM
    # (no double-buffering, no pipeline prologue/epilogue).
    vmem_spec = pl.BlockSpec(memory_space=pltpu.MemorySpace.VMEM)
    return pl.pallas_call(
        fused_model_kernel,
        out_shape=jax.ShapeDtypeStruct((b, e), jnp.float32),
        in_specs=[vmem_spec, vmem_spec, vmem_spec, vmem_spec],
        out_specs=vmem_spec,
    )(patches2d, wc, w0, w1)


# ------------------------------ reference (pure JAX) --------------------------
def reference_forward(x, conv_w, w_emb0, w_emb1, w_sc0, w_sc1):
    hp = lax.Precision.HIGHEST
    conv = lax.conv_general_dilated(
        x, conv_w, (STRIDE, STRIDE), [(PAD, PAD), (PAD, PAD)],
        dimension_numbers=('NCHW', 'OIHW', 'NCHW'), precision=hp)
    conv = jnp.maximum(conv, 0.0)
    feat = jnp.mean(conv, axis=(2, 3))                                   # [B, Cenc]
    leaky = lambda v: jnp.where(v >= 0, v, LEAKY_SLOPE * v)
    emb = jnp.dot(leaky(jnp.dot(feat, w_emb0.T, precision=hp)),
                  w_emb1.T, precision=hp)
    scaler = jax.nn.sigmoid(jnp.dot(leaky(jnp.dot(feat, w_sc0.T, precision=hp)),
                                    w_sc1.T, precision=hp))
    norm = jnp.linalg.norm(emb, axis=1, keepdims=True)
    return (emb / norm) * scaler


# ------------------------------ parameter init --------------------------------
def xavier_uniform(key, shape):
    fan_out, fan_in = shape[0], int(jnp.prod(jnp.array(shape[1:])))
    bound = (6.0 / (fan_in + fan_out)) ** 0.5
    return jax.random.uniform(key, shape, jnp.float32, -bound, bound)


if __name__ == "__main__":
    # args: input_features=4, channels_conv_size(surrogate Cenc)=64,
    #       embedding_layers=2, embedding_layers_hidden=32, embedding_size=16,
    #       leaky_relu_slope=0.01, embedding_init='xavier',
    #       is_layers_embedding_batchnorm=False, layers_embedding_dropout=0,
    #       embedding_norm='none'
    B, Cin, H, W = 2, 4, 16, 16
    Cenc, Hemb, E = 64, 32, 16
    F = Cenc * 1 * 1  # encoder spatial output is 1x1

    OH = (H + 2 * PAD - KH) // STRIDE + 1
    OW = (W + 2 * PAD - KW) // STRIDE + 1
    P = OH * OW       # patches per image (64)

    key = jax.random.PRNGKey(0)
    k0, k1, k2, k3, k4, k5 = jax.random.split(key, 6)

    x = jax.random.normal(k0, (B, Cin, H, W), jnp.float32)
    conv_w = xavier_uniform(k1, (Cenc, Cin, 7, 7))      # Conv2d weight [Cout,Cin,7,7]
    w_emb0 = xavier_uniform(k2, (Hemb, F))              # Linear(F->H), weight [H, F]
    w_emb1 = xavier_uniform(k3, (E, Hemb))              # Linear(H->E), weight [E, H]
    w_sc0 = xavier_uniform(k4, (Hemb, F))               # scaler Linear(F->H)
    w_sc1 = xavier_uniform(k5, (1, Hemb))               # scaler Linear(H->1)

    # one-time weight prep (out of the per-call jit path)
    wc, w0, w1 = prepare_params(conv_w, w_emb0, w_emb1, w_sc0, w_sc1, P)

    out = model_forward(x, wc, w0, w1)
    out = jax.block_until_ready(out)

    ref = reference_forward(x, conv_w, w_emb0, w_emb1, w_sc0, w_sc1)
    assert out.shape == (B, E)
    assert bool(jnp.all(jnp.isfinite(out)))
    # tolerance covers differing (f32-accurate) MXU reduction orders plus the
    # approx EUP reciprocal used for the sigmoid denominator in the epilogue
    assert bool(jnp.allclose(out, ref, atol=5e-3, rtol=5e-3)), (
        float(jnp.max(jnp.abs(out - ref))))

    print("KERNEL_OK")
</pallas_src>

<mosaic_0001>
module attributes {stable_mosaic.version = 11 : i64} {
  func.func @fused_model_kernel(%arg0: memref<128x196xf32, #tpu.memory_space<vmem>>, %arg1: memref<196x64xf32, #tpu.memory_space<vmem>>, %arg2: memref<64x64xf32, #tpu.memory_space<vmem>>, %arg3: memref<64x17xf32, #tpu.memory_space<vmem>>, %arg4: memref<2x16xf32, #tpu.memory_space<vmem>>) attributes {dimension_semantics = [], scalar_prefetch = 0 : i64, scratch_operands = 0 : i64, tpu.core_type = #tpu.core_type<tc>} {
    %c0 = arith.constant 0 : index
    %c0_0 = arith.constant 0 : index
    %0 = vector.load %arg0[%c0, %c0_0] : memref<128x196xf32, #tpu.memory_space<vmem>>, vector<128x196xf32>
    %c0_1 = arith.constant 0 : index
    %c0_2 = arith.constant 0 : index
    %1 = vector.load %arg1[%c0_1, %c0_2] : memref<196x64xf32, #tpu.memory_space<vmem>>, vector<196x64xf32>
    %cst = arith.constant dense<0.000000e+00> : vector<128x64xf32>
    %2 = tpu.matmul %0, %1, %cst {dimension_numbers = #tpu.dot_dimension_numbers<[1], [0], [0], [1], [0, 0, 1, 1], [], []>} : vector<128x196xf32>, vector<196x64xf32>, vector<128x64xf32> -> vector<128x64xf32>
    %cst_3 = arith.constant 0.000000e+00 : f32
    %3 = vector.broadcast %cst_3 : f32 to vector<128x64xf32>
    %4 = arith.maximumf %2, %3 : vector<128x64xf32>
    %5 = vector.shape_cast %4 : vector<128x64xf32> to vector<2x64x64xf32>
    %cst_4 = arith.constant dense<0.000000e+00> : vector<2x64xf32>
    %6 = vector.multi_reduction <add>, %5, %cst_4 [1] : vector<2x64x64xf32> to vector<2x64xf32>
    %c0_5 = arith.constant 0 : index
    %c0_6 = arith.constant 0 : index
    %7 = vector.load %arg2[%c0_5, %c0_6] : memref<64x64xf32, #tpu.memory_space<vmem>>, vector<64x64xf32>
    %cst_7 = arith.constant dense<0.000000e+00> : vector<2x64xf32>
    %8 = tpu.matmul %6, %7, %cst_7 {dimension_numbers = #tpu.dot_dimension_numbers<[1], [0], [0], [1], [0, 0, 1, 1], [], []>} : vector<2x64xf32>, vector<64x64xf32>, vector<2x64xf32> -> vector<2x64xf32>
    %cst_8 = arith.constant 0.000000e+00 : f32
    %9 = vector.broadcast %cst_8 : f32 to vector<2x64xf32>
    %10 = arith.cmpf oge, %8, %9 : vector<2x64xf32>
    %cst_9 = arith.constant 0.00999999977 : f32
    %11 = vector.broadcast %cst_9 : f32 to vector<2x64xf32>
    %12 = arith.mulf %11, %8 : vector<2x64xf32>
    %13 = arith.select %10, %8, %12 : vector<2x64xi1>, vector<2x64xf32>
    %c0_10 = arith.constant 0 : index
    %c0_11 = arith.constant 0 : index
    %14 = vector.load %arg3[%c0_10, %c0_11] : memref<64x17xf32, #tpu.memory_space<vmem>>, vector<64x17xf32>
    %cst_12 = arith.constant dense<0.000000e+00> : vector<2x17xf32>
    %15 = tpu.matmul %13, %14, %cst_12 {dimension_numbers = #tpu.dot_dimension_numbers<[1], [0], [0], [1], [0, 0, 1, 1], [], []>} : vector<2x64xf32>, vector<64x17xf32>, vector<2x17xf32> -> vector<2x17xf32>
    %16 = vector.extract_strided_slice %15 {offsets = [0, 0], sizes = [2, 16], strides = [1, 1]} : vector<2x17xf32> to vector<2x16xf32>
    %17 = vector.extract_strided_slice %15 {offsets = [0, 16], sizes = [2, 1], strides = [1, 1]} : vector<2x17xf32> to vector<2x1xf32>
    %18 = math.absf %17 : vector<2x1xf32>
    %cst_13 = arith.constant 0.000000e+00 : f32
    %19 = vector.broadcast %cst_13 : f32 to vector<2x1xf32>
    %20 = arith.subf %19, %18 : vector<2x1xf32>
    %21 = math.exp %20 : vector<2x1xf32>
    %cst_14 = arith.constant 1.000000e+00 : f32
    %22 = vector.broadcast %cst_14 : f32 to vector<2x1xf32>
    %23 = arith.addf %22, %21 : vector<2x1xf32>
    %24 = tpu.reciprocal %23 {approx = true} : vector<2x1xf32> -> vector<2x1xf32>
    %cst_15 = arith.constant 0.000000e+00 : f32
    %25 = vector.broadcast %cst_15 : f32 to vector<2x1xf32>
    %26 = arith.cmpf oge, %17, %25 : vector<2x1xf32>
    %27 = arith.mulf %21, %24 : vector<2x1xf32>
    %28 = arith.select %26, %24, %27 : vector<2x1xi1>, vector<2x1xf32>
    %29 = arith.mulf %16, %16 : vector<2x16xf32>
    %cst_16 = arith.constant dense<0.000000e+00> : vector<2xf32>
    %30 = vector.multi_reduction <add>, %29, %cst_16 [1] : vector<2x16xf32> to vector<2xf32>
    %31 = vector.shape_cast %30 : vector<2xf32> to vector<2x1xf32>
    %cst_17 = arith.constant 9.99999996E-13 : f32
    %32 = vector.broadcast %cst_17 : f32 to vector<2x1xf32>
    %33 = arith.addf %31, %32 : vector<2x1xf32>
    %34 = math.rsqrt %33 : vector<2x1xf32>
    %35 = vector.broadcast %34 : vector<2x1xf32> to vector<2x16xf32>
    %36 = arith.mulf %16, %35 : vector<2x16xf32>
    %37 = vector.broadcast %28 : vector<2x1xf32> to vector<2x16xf32>
    %38 = arith.mulf %36, %37 : vector<2x16xf32>
    %c0_18 = arith.constant 0 : index
    %c0_19 = arith.constant 0 : index
    %39 = vector.load %arg4[%c0_18, %c0_19] : memref<2x16xf32, #tpu.memory_space<vmem>>, vector<2x16xf32>
    tpu.vector_store %arg4[%c0_18, %c0_19], %38 {strides = array<i32>} : memref<2x16xf32, #tpu.memory_space<vmem>>, vector<2x16xf32>,
    return
  }
}

</mosaic_0001>

<bundles_post_ra>
// kernel: model_forward.1
= control target key start
LH: loop header
LB: loop body
LE: loop exit
PB: predicated region body
PF: predicated region fallthrough
CT: control target
= control target key end

     0   :  { %v696_v1 = vmov 0.0   ;;  %vm75_vm0 = vcmask 556032   ;;  %s1065_s0 = inlined_call_operand.vmem [shape: f32[128,196], index: 0, kind: input, shape index: {}]   ;;  %s1066_s1 = inlined_call_operand.vmem [shape: f32[196,64], index: 1, kind: input, shape index: {}]   ;;  %s1067_s2 = inlined_call_operand.vmem [shape: f32[64,64], index: 2, kind: input, shape index: {}]   ;;  %s1068_s3 = inlined_call_operand.vmem [shape: f32[64,17], index: 3, kind: input, shape index: {}]   ;;  %s1069_s4 = inlined_call_operand.hbm [shape: f32[2,16], index: 4, kind: output, shape index: {}]  }
   0x1   :  { %v65_v0 = vld [vmem:[%s1066_s1 + $0x78] sm:$0xff]  ;;  %128 = vmatprep.subr.mxu0 %v696_v1  ;;  %v64_v2 = vld [vmem:[%s1066_s1 + $0x70] sm:$0xff]  ;;  %613 = vmatprep.subr.mxu1 %v696_v1  ;;  %v63_v3 = vld [vmem:[%s1066_s1 + $0x68] sm:$0xff] }
   0x2   :  { %129 = vmatpush1.msra.mxu0 %v65_v0  ;;  %638 = vmatpush1.msra.mxu1 %v65_v0  ;;  %v62_v4 = vld [vmem:[%s1066_s1 + $0x60] sm:$0xff]  ;;  %v61_v5 = vld [vmem:[%s1066_s1 + $0x58] sm:$0xff]  ;;  %v60_v6 = vld [vmem:[%s1066_s1 + $0x50] sm:$0xff] }
   0x3   :  { %130 = vmatprep.subr.mxu0 %v696_v1  ;;  %614 = vmatprep.subr.mxu1 %v696_v1  ;;  %v59_v7 = vld [vmem:[%s1066_s1 + $0x48] sm:$0xff]  ;;  %v58_v8 = vld [vmem:[%s1066_s1 + $0x40] sm:$0xff]  ;;  %v57_v9 = vld [vmem:[%s1066_s1 + $0x38] sm:$0xff] }
   0x4   :  { %131 = vmatpush1.msra.mxu0 %v64_v2  ;;  %639 = vmatpush1.msra.mxu1 %v64_v2  ;;  %v19_v10 = vld [vmem:[%s1065_s0 + $0x8] sm:$0xff]  ;;  %v56_v11 = vld [vmem:[%s1066_s1 + $0x30] sm:$0xff] }
   0x5   :  { %132 = vmatprep.subr.mxu0 %v696_v1  ;;  %615 = vmatprep.subr.mxu1 %v696_v1  ;;  %v55_v12 = vld [vmem:[%s1066_s1 + $0x28] sm:$0xff] }
   0x6   :  { %133 = vmatpush1.msra.mxu0 %v63_v3  ;;  %640 = vmatpush1.msra.mxu1 %v63_v3 }
   0x7   :  { %134 = vmatprep.subr.mxu0 %v696_v1  ;;  %616 = vmatprep.subr.mxu1 %v696_v1 }
   0x8   :  { %135 = vmatpush1.msra.mxu0 %v62_v4  ;;  %641 = vmatpush1.msra.mxu1 %v62_v4 }
   0x9   :  { %136 = vmatprep.subr.mxu0 %v696_v1  ;;  %617 = vmatprep.subr.mxu1 %v696_v1 }
   0xa   :  { %137 = vmatpush1.msra.mxu0 %v61_v5  ;;  %642 = vmatpush1.msra.mxu1 %v61_v5 }
   0xb   :  { %138 = vmatprep.subr.mxu0 %v696_v1  ;;  %618 = vmatprep.subr.mxu1 %v696_v1 }
   0xc   :  { %139 = vmatpush1.msra.mxu0 %v60_v6  ;;  %643 = vmatpush1.msra.mxu1 %v60_v6 }
   0xd   :  { %140 = vmatprep.subr.mxu0 %v696_v1  ;;  %619 = vmatprep.subr.mxu1 %v696_v1 }
   0xe   :  { %141 = vmatpush1.msra.mxu0 %v59_v7  ;;  %644 = vmatpush1.msra.mxu1 %v59_v7 }
   0xf   :  { %142 = vmatprep.subr.mxu0 %v696_v1  ;;  %620 = vmatprep.subr.mxu1 %v696_v1 }
  0x10   :  { %143 = vmatpush1.msra.mxu0 %v58_v8  ;;  %645 = vmatpush1.msra.mxu1 %v58_v8 }
  0x11   :  { %144 = vmatprep.subr.mxu0 %v696_v1  ;;  %621 = vmatprep.subr.mxu1 %v696_v1 }
  0x12   :  { %145 = vmatpush1.msra.mxu0 %v57_v9  ;;  %646 = vmatpush1.msra.mxu1 %v57_v9 }
  0x13   :  { %146 = vmatprep.subr.mxu0 %v696_v1  ;;  %539 = vmatprep.mubr.msk.f32.mxu0 %vm75_vm0, %v19_v10 }
  0x14   :  { %9 = vsyncpa [#allocation3], 0  ;;  %147 = vmatpush1.msra.mxu0 %v56_v11  ;;  %622 = vmatprep.subr.mxu1 %v696_v1  ;;  %v54_v13 = vld [vmem:[%s1066_s1 + $0x20] sm:$0xff]  ;;  %v53_v14 = vld [vmem:[%s1066_s1 + $0x18] sm:$0xff]  ;;  %vm124_vm1 = vcmask 1043456   ;;  %vm697_vm2 = vmmov 0  }
  0x15   :  { %148 = vmatprep.subr.mxu0 %v696_v1  ;;  %647 = vmatpush1.msra.mxu1 %v56_v11  ;;  %v52_v15 = vld [vmem:[%s1066_s1 + $0x10] sm:$0xff]  ;;  %v51_v16 = vld [vmem:[%s1066_s1 + $0x8] sm:$0xff]  ;;  %v50_v17 = vld [vmem:[%s1066_s1] sm:$0xff]  ;;  %vm289_vm3 = vcmask 523264   ;;  %vm342_vm4 = vcmask 1041409   ;;  %vm510_vm6 = vcmask 123904  }
  0x16   :  { %149 = vmatpush1.msra.mxu0 %v55_v12  ;;  %623 = vmatprep.subr.mxu1 %v696_v1  ;;  %v74_v18 = vld [vmem:[%s1066_s1 + $0xc0] sm:$0xf]  ;;  %v73_v19 = vld [vmem:[%s1066_s1 + $0xb8] sm:$0xff]  ;;  %v72_v20 = vld [vmem:[%s1066_s1 + $0xb0] sm:$0xff] }
  0x17   :  { %150 = vmatprep.subr.mxu0 %v696_v1  ;;  %648 = vmatpush1.msra.mxu1 %v55_v12  ;;  %v71_v21 = vld [vmem:[%s1066_s1 + $0xa8] sm:$0xff]  ;;  %v70_v22 = vld [vmem:[%s1066_s1 + $0xa0] sm:$0xff]  ;;  %v69_v23 = vld [vmem:[%s1066_s1 + $0x98] sm:$0xff] }
  0x18   :  { %151 = vmatpush1.msra.mxu0 %v54_v13  ;;  %624 = vmatprep.subr.mxu1 %v696_v1  ;;  %v68_v24 = vld [vmem:[%s1066_s1 + $0x90] sm:$0xff]  ;;  %v67_v25 = vld [vmem:[%s1066_s1 + $0x88] sm:$0xff]  ;;  %v66_v26 = vld [vmem:[%s1066_s1 + $0x80] sm:$0xff] }
  0x19   :  { %152 = vmatprep.subr.mxu0 %v696_v1  ;;  %649 = vmatpush1.msra.mxu1 %v54_v13  ;;  %v18_v27 = vld [vmem:[%s1065_s0] sm:$0xff]  ;;  %v21_v28 = vld [vmem:[%s1065_s0 + $0x18] sm:$0xff]  ;;  %v40_v30 = vld [vmem:[%s1065_s0 + $0xb0] sm:$0xff] }
  0x1a   :  { %153 = vmatpush1.msra.mxu0 %v53_v14  ;;  %625 = vmatprep.subr.mxu1 %v696_v1  ;;  %v41_v29 = vld [vmem:[%s1065_s0 + $0xb8] sm:$0xff]  ;;  %v43_v31 = vld [vmem:[%s1065_s0 + $0xc8] sm:$0xff]  ;;  %v20_v32 = vld [vmem:[%s1065_s0 + $0x10] sm:$0xff] }
  0x1b   :  { %154 = vmatprep.subr.mxu0 %v696_v1  ;;  %650 = vmatpush1.msra.mxu1 %v53_v14  ;;  %v23_v33 = vld [vmem:[%s1065_s0 + $0x28] sm:$0xff]  ;;  %v42_v34 = vld [vmem:[%s1065_s0 + $0xc0] sm:$0xff]  ;;  %v45_v35 = vld [vmem:[%s1065_s0 + $0xd8] sm:$0xff] }
  0x1c   :  { %155 = vmatpush1.msra.mxu0 %v52_v15  ;;  %626 = vmatprep.subr.mxu1 %v696_v1  ;;  %v22_v36 = vld [vmem:[%s1065_s0 + $0x20] sm:$0xff]  ;;  %v25_v37 = vld [vmem:[%s1065_s0 + $0x38] sm:$0xff]  ;;  %v44_v38 = vld [vmem:[%s1065_s0 + $0xd0] sm:$0xff] }
  0x1d   :  { %156 = vmatprep.subr.mxu0 %v696_v1  ;;  %651 = vmatpush1.msra.mxu1 %v52_v15  ;;  %v47_v39 = vld [vmem:[%s1065_s0 + $0xe8] sm:$0xff]  ;;  %v24_v40 = vld [vmem:[%s1065_s0 + $0x30] sm:$0xff]  ;;  %v46_v42 = vld [vmem:[%s1065_s0 + $0xe0] sm:$0xff] }
  0x1e   :  { %157 = vmatpush1.msra.mxu0 %v51_v16  ;;  %627 = vmatprep.subr.mxu1 %v696_v1  ;;  %v27_v41 = vld [vmem:[%s1065_s0 + $0x48] sm:$0xff]  ;;  %v49_v43 = vld [vmem:[%s1065_s0 + $0xf8] sm:$0xff]  ;;  %v26_v44 = vld [vmem:[%s1065_s0 + $0x40] sm:$0xff] }
  0x1f   :  { %158 = vmatprep.subr.mxu0 %v696_v1  ;;  %652 = vmatpush1.msra.mxu1 %v51_v16  ;;  %v29_v45 = vld [vmem:[%s1065_s0 + $0x58] sm:$0xff]  ;;  %v48_v46 = vld [vmem:[%s1065_s0 + $0xf0] sm:$0xff]  ;;  %v31_v48 = vld [vmem:[%s1065_s0 + $0x68] sm:$0xff] }
  0x20   :  { %159 = vmatpush1.msra.mxu0 %v50_v17  ;;  %628 = vmatprep.subr.mxu1 %v696_v1  ;;  %v28_v47 = vld [vmem:[%s1065_s0 + $0x50] sm:$0xff]  ;;  %v30_v49 = vld [vmem:[%s1065_s0 + $0x60] sm:$0xff]  ;;  %v33_v50 = vld [vmem:[%s1065_s0 + $0x78] sm:$0xff] }
  0x21   :  { %174 = vmatprep.subr.mxu0 %v696_v1  ;;  %653 = vmatpush1.msra.mxu1 %v50_v17  ;;  %v32_v51 = vld [vmem:[%s1065_s0 + $0x70] sm:$0xff]  ;;  %v35_v52 = vld [vmem:[%s1065_s0 + $0x88] sm:$0xff]  ;;  %v34_v53 = vld [vmem:[%s1065_s0 + $0x80] sm:$0xff] }
  0x22   :  { %538 = vmatpush2.msk.msra.mxu0 %vm124_vm1, %v74_v18  ;;  %629 = vmatprep.subr.mxu1 %v696_v1  ;;  %v37_v54 = vld [vmem:[%s1065_s0 + $0x98] sm:$0xff]  ;;  %v36_v55 = vld [vmem:[%s1065_s0 + $0x90] sm:$0xff]  ;;  %v39_v56 = vld [vmem:[%s1065_s0 + $0xa8] sm:$0xff] }
  0x23   :  { %176 = vmatprep.subr.mxu0 %v696_v1  ;;  %654 = vmatpush2.msk.msra.mxu1 %vm124_vm1, %v74_v18  ;;  %v38_v57 = vld [vmem:[%s1065_s0 + $0xa0] sm:$0xff]  ;;  %v339_v58 = vld [vmem:[%s1067_s2 + $0x38] sm:$0xff]  ;;  %v338_v59 = vld [vmem:[%s1067_s2 + $0x30] sm:$0xff] }
  0x24   :  { %177 = vmatpush2.msra.mxu0 %v73_v19  ;;  %630 = vmatprep.subr.mxu1 %v696_v1  ;;  %v337_v60 = vld [vmem:[%s1067_s2 + $0x28] sm:$0xff]  ;;  %v336_v61 = vld [vmem:[%s1067_s2 + $0x20] sm:$0xff]  ;;  %v335_v62 = vld [vmem:[%s1067_s2 + $0x18] sm:$0xff] }
  0x25   :  { %178 = vmatprep.subr.mxu0 %v696_v1  ;;  %655 = vmatpush2.msra.mxu1 %v73_v19  ;;  %v334_v63 = vld [vmem:[%s1067_s2 + $0x10] sm:$0xff]  ;;  %v333_v0 = vld [vmem:[%s1067_s2 + $0x8] sm:$0xff]  ;;  %v332_v2 = vld [vmem:[%s1067_s2] sm:$0xff] }
  0x26   :  { %179 = vmatpush2.msra.mxu0 %v72_v20  ;;  %631 = vmatprep.subr.mxu1 %v696_v1 }
  0x27   :  { %180 = vmatprep.subr.mxu0 %v696_v1  ;;  %656 = vmatpush2.msra.mxu1 %v72_v20 }
  0x28   :  { %181 = vmatpush2.msra.mxu0 %v71_v21  ;;  %632 = vmatprep.subr.mxu1 %v696_v1 }
  0x29   :  { %182 = vmatprep.subr.mxu0 %v696_v1  ;;  %657 = vmatpush2.msra.mxu1 %v71_v21 }
  0x2a   :  { %183 = vmatpush2.msra.mxu0 %v70_v22  ;;  %633 = vmatprep.subr.mxu1 %v696_v1 }
  0x2b   :  { %184 = vmatprep.subr.mxu0 %v696_v1  ;;  %658 = vmatpush2.msra.mxu1 %v70_v22 }
  0x2c   :  { %185 = vmatpush2.msra.mxu0 %v69_v23  ;;  %634 = vmatprep.subr.mxu1 %v696_v1 }
  0x2d   :  { %186 = vmatprep.subr.mxu0 %v696_v1  ;;  %659 = vmatpush2.msra.mxu1 %v69_v23 }
  0x2e   :  { %187 = vmatpush2.msra.mxu0 %v68_v24  ;;  %635 = vmatprep.subr.mxu1 %v696_v1 }
  0x2f   :  { %188 = vmatprep.subr.mxu0 %v696_v1  ;;  %660 = vmatpush2.msra.mxu1 %v68_v24 }
  0x30   :  { %189 = vmatpush2.msra.mxu0 %v67_v25  ;;  %636 = vmatprep.subr.mxu1 %v696_v1 }
  0x31   :  { %190 = vmatprep.subr.mxu0 %v696_v1  ;;  %661 = vmatpush2.msra.mxu1 %v67_v25 }
  0x32   :  { %191 = vmatpush2.msra.mxu0 %v66_v26  ;;  %637 = vmatprep.subr.mxu1 %v696_v1 }
  0x33   :  { %193 = vmatmul.mubr.f32.vlgmr.msra.gmra.mxu0 %v18_v27  ;;  %662 = vmatpush2.msra.mxu1 %v66_v26 }
  0x34   :  { %540 = vmatprep.mubr.msk.f32.mxu0 %vm75_vm0, %v21_v28  ;;  %550 = vmatprep.mubr.msk.f32.mxu1 %vm75_vm0, %v41_v29 }
  0x35   :  { %248 = vmatmul.mubr.f32.vlgmr.msra.gmra.mxu1 %v40_v30  ;;  %575 = vmatprep.subr.mxu1 %v696_v1 }
  0x36   :  { %551 = vmatprep.mubr.msk.f32.mxu1 %vm75_vm0, %v43_v31  ;;  %576 = vmatpush3.msra.mxu1 %v339_v58 }
  0x37   :  { %198 = vmatmul.mubr.f32.gmra.mxu0 %v20_v32  ;;  %577 = vmatprep.subr.mxu1 %v696_v1 }
  0x38   :  { %541 = vmatprep.mubr.msk.f32.mxu0 %vm75_vm0, %v23_v33  ;;  %578 = vmatpush3.msra.mxu1 %v338_v59 }
  0x39   :  { %253 = vmatmul.mubr.f32.gmra.mxu1 %v42_v34  ;;  %579 = vmatprep.subr.mxu1 %v696_v1 }
  0x3a   :  { %552 = vmatprep.mubr.msk.f32.mxu1 %vm75_vm0, %v45_v35  ;;  %580 = vmatpush3.msra.mxu1 %v337_v60 }
  0x3b   :  { %203 = vmatmul.mubr.f32.gmra.mxu0 %v22_v36  ;;  %581 = vmatprep.subr.mxu1 %v696_v1 }
  0x3c   :  { %542 = vmatprep.mubr.msk.f32.mxu0 %vm75_vm0, %v25_v37  ;;  %582 = vmatpush3.msra.mxu1 %v336_v61 }
  0x3d   :  { %258 = vmatmul.mubr.f32.gmra.mxu1 %v44_v38  ;;  %583 = vmatprep.subr.mxu1 %v696_v1 }
  0x3e   :  { %553 = vmatprep.mubr.msk.f32.mxu1 %vm75_vm0, %v47_v39  ;;  %584 = vmatpush3.msra.mxu1 %v335_v62 }
  0x3f   :  { %208 = vmatmul.mubr.f32.gmra.mxu0 %v24_v40  ;;  %585 = vmatprep.subr.mxu1 %v696_v1 }
  0x40   :  { %543 = vmatprep.mubr.msk.f32.mxu0 %vm75_vm0, %v27_v41  ;;  %586 = vmatpush3.msra.mxu1 %v334_v63 }
  0x41   :  { %263 = vmatmul.mubr.f32.gmra.mxu1 %v46_v42  ;;  %587 = vmatprep.subr.mxu1 %v696_v1 }
  0x42   :  { %554 = vmatprep.mubr.msk.f32.mxu1 %vm75_vm0, %v49_v43  ;;  %588 = vmatpush3.msra.mxu1 %v333_v0 }
  0x43   :  { %213 = vmatmul.mubr.f32.gmra.mxu0 %v26_v44  ;;  %589 = vmatprep.subr.mxu1 %v696_v1 }
  0x44   :  { %544 = vmatprep.mubr.msk.f32.mxu0 %vm75_vm0, %v29_v45  ;;  %590 = vmatpush3.msra.mxu1 %v332_v2 }
  0x45   :  { %268 = vmatmul.mubr.f32.gmra.mxu1 %v48_v46  ;;  %594 = vmatprep.subr.mxu1 %v696_v1 }
  0x46   :  { %591 = vmatprep.mubr.msk.f32.mxu1 %vm697_vm2, %v696_v1 }
  0x47   :  { %218 = vmatmul.mubr.f32.gmra.mxu0 %v28_v47 }
  0x48   :  { %545 = vmatprep.mubr.msk.f32.mxu0 %vm75_vm0, %v31_v48 }
  0x4b   :  { %223 = vmatmul.mubr.f32.gmra.mxu0 %v30_v49 }
  0x4c   :  { %546 = vmatprep.mubr.msk.f32.mxu0 %vm75_vm0, %v33_v50 }
  0x4f   :  { %228 = vmatmul.mubr.f32.gmra.mxu0 %v32_v51 }
  0x50   :  { %547 = vmatprep.mubr.msk.f32.mxu0 %vm75_vm0, %v35_v52 }
  0x53   :  { %233 = vmatmul.mubr.f32.gmra.mxu0 %v34_v53 }
  0x54   :  { %548 = vmatprep.mubr.msk.f32.mxu0 %vm75_vm0, %v37_v54 }
  0x57   :  { %238 = vmatmul.mubr.f32.gmra.mxu0 %v36_v55 }
  0x58   :  { %549 = vmatprep.mubr.msk.f32.mxu0 %vm75_vm0, %v39_v56 }
  0x5b   :  { %243 = vmatmul.mubr.f32.gmra.mxu0 %v38_v57 }
  0xf3   :  { %v194_v3 = vpop.f32.mrf.mxu0 }
  0xf4   :  { %v273_v27 = vmax.f32 %v194_v3, 0.0 }
  0xf5   :  { %v196_v4 = vpop.f32.mrf.mxu0  ;;  %v997_v5 = vpop.f32.mrf.mxu1 }
  0xf6   :  { %v290_v33 = vsel %vm289_vm3, %v273_v27, 0.0  ;;  %v284_v60 = vmax.f32 %v997_v5, 0.0 }
  0xf7   :  { %v199_v6 = vpop.f32.mrf.mxu0  ;;  %v251_v7 = vpop.f32.mrf.mxu1 }
  0xf8   :  { %v274_v25 = vmax.f32 %v199_v6, 0.0  ;;  %v316_v6 = vsel %vm289_vm3, %v284_v60, 0.0 }
  0xf9   :  { %v201_v8 = vpop.f32.mrf.mxu0  ;;  %v999_v9 = vpop.f32.mrf.mxu1 }
  0xfa   :  { %v291_v30 = vsel %vm289_vm3, %v274_v25, 0.0  ;;  %v285_v2 = vmax.f32 %v999_v9, 0.0 }
  0xfb   :  { %v204_v10 = vpop.f32.mrf.mxu0  ;;  %v256_v11 = vpop.f32.mrf.mxu1  ;;  %v292_v36 = vadd.f32 %v291_v30, %v290_v33  ;;  %v426_v30 = vld [vmem:[%s1068_s3 + $0x38] sm:$0xff]  ;;  %v424_v33 = vld [vmem:[%s1068_s3 + $0x28] sm:$0xff] }
  0xfc   :  { %v275_v28 = vmax.f32 %v204_v10, 0.0  ;;  %v318_v11 = vsel %vm289_vm3, %v285_v2, 0.0 }
  0xfd   :  { %v206_v12 = vpop.f32.mrf.mxu0  ;;  %v1001_v13 = vpop.f32.mrf.mxu1 }
  0xfe   :  { %v293_v34 = vsel %vm289_vm3, %v275_v28, 0.0  ;;  %v286_v7 = vmax.f32 %v1001_v13, 0.0 }
  0xff   :  { %v209_v14 = vpop.f32.mrf.mxu0  ;;  %v261_v15 = vpop.f32.mrf.mxu1  ;;  %v294_v40 = vadd.f32 %v293_v34, %v292_v36  ;;  %v423_v34 = vld [vmem:[%s1068_s3 + $0x20] sm:$0xff]  ;;  %v421_v36 = vld [vmem:[%s1068_s3 + $0x10] sm:$0xff] }
 0x100   :  { %v276_v31 = vmax.f32 %v209_v14, 0.0  ;;  %v320_v15 = vsel %vm289_vm3, %v286_v7, 0.0 }
 0x101   :  { %v211_v16 = vpop.f32.mrf.mxu0  ;;  %v1003_v17 = vpop.f32.mrf.mxu1 }
 0x102   :  { %v295_v38 = vsel %vm289_vm3, %v276_v31, 0.0  ;;  %v287_v12 = vmax.f32 %v1003_v17, 0.0 }
 0x103   :  { %v214_v18 = vpop.f32.mrf.mxu0  ;;  %v266_v19 = vpop.f32.mrf.mxu1  ;;  %v296_v44 = vadd.f32 %v295_v38, %v294_v40  ;;  %v419_v38 = vld [vmem:[%s1068_s3] sm:$0xff] }
 0x104   :  { %v277_v35 = vmax.f32 %v214_v18, 0.0  ;;  %v322_v9 = vsel %vm289_vm3, %v287_v12, 0.0 }
 0x105   :  { %v216_v20 = vpop.f32.mrf.mxu0  ;;  %v269_v21 = vpop.f32.mrf.mxu1 }
 0x106   :  { %v297_v42 = vsel %vm289_vm3, %v277_v35, 0.0  ;;  %v288_v5 = vmax.f32 %v269_v21, 0.0  ;;  %v422_v35 = vld [vmem:[%s1068_s3 + $0x18] sm:$0xff] }
 0x107   :  { %v219_v22 = vpop.f32.mrf.mxu0  ;;  %v271_v23 = vpop.f32.mrf.mxu1  ;;  %v298_v48 = vadd.f32 %v297_v42, %v296_v44 }
 0x108   :  { %v278_v39 = vmax.f32 %v219_v22, 0.0  ;;  %v324_v19 = vsel %vm289_vm3, %v288_v5, 0.0 }
 0x109   :  { %v221_v24 = vpop.f32.mrf.mxu0 }
 0x10a   :  { %v299_v46 = vsel %vm289_vm3, %v278_v39, 0.0 }
 0x10b   :  { %v224_v26 = vpop.f32.mrf.mxu0  ;;  %v300_v53 = vadd.f32 %v299_v46, %v298_v48 }
 0x10c   :  { %v279_v43 = vmax.f32 %v224_v26, 0.0 }
 0x10d   :  { %v226_v29 = vpop.f32.mrf.mxu0 }
 0x10e   :  { %v301_v50 = vsel %vm289_vm3, %v279_v43, 0.0  ;;  %v698_v43 = vmov 16  }
 0x10f   :  { %v229_v32 = vpop.f32.mrf.mxu0  ;;  %v302_v57 = vadd.f32 %v301_v50, %v300_v53  ;;  %667 = vset.pattern.permute.xlu0 %v698_v43 }
 0x110   :  { %v280_v47 = vmax.f32 %v229_v32, 0.0  ;;  %v425_v32 = vld [vmem:[%s1068_s3 + $0x30] sm:$0xff] }
 0x111   :  { %v231_v37 = vpop.f32.mrf.mxu0 }
 0x112   :  { %v303_v55 = vsel %vm289_vm3, %v280_v47, 0.0  ;;  %v420_v37 = vld [vmem:[%s1068_s3 + $0x8] sm:$0xff]  ;;  %s699_s3 = smov [#allocation2]  }
 0x113   :  { %v234_v41 = vpop.f32.mrf.mxu0  ;;  %v304_v62 = vadd.f32 %v303_v55, %v302_v57  ;;  %s530_s25 = sshll.u32 %s699_s3, 4  ;;  %s531_s25 = int_to_ptr.vmem [resolvable:$true] %s530_s25 }
 0x114   :  { %v281_v51 = vmax.f32 %v234_v41, 0.0  ;;  %s674_s26 = scalar_lea.vmem %s531_s25, 32  ;;  %p679_p1 = scmp.lt.s32.totalorder %s531_s25, %s531_s25 }
 0x115   :  { %v236_v45 = vpop.f32.mrf.mxu0  ;;  %v305_v8 = vrot.slane %v304_v62, 4  ;;  %p675_p0 = scmp.ne.s32.totalorder %s531_s25, %s674_s26  ;;  %p680_p2 = scmp.lt.s32.totalorder %s674_s26, %s674_s26 }
 0x116   :  { %v311_v59 = vsel %vm289_vm3, %v281_v51, 0.0 }
 0x117   :  { %v239_v49 = vpop.f32.mrf.mxu0  ;;  %v306_v16 = vadd.f32 %v305_v8, %v304_v62  ;;  %p681_p3 = por %p680_p2, %p679_p1 }
 0x118   :  { %v282_v52 = vmax.f32 %v239_v49, 0.0 }
 0x119   :  { %v241_v54 = vpop.f32.mrf.mxu0  ;;  %v307_v22 = vrot.slane %v306_v16, 2  ;;  %p682_p4 = pnand %p681_p3, %p675_p0 }
 0x11a   :  { %v312_v56 = vsel %vm289_vm3, %v282_v52, 0.0 }
 0x11b   :  { %v244_v58 = vpop.f32.mrf.mxu0  ;;  %v313_v63 = vadd.f32 %v312_v56, %v311_v59  ;;  %v308_v24 = vadd.f32 %v307_v22, %v306_v16 }
 0x11c   :  { %v283_v61 = vmax.f32 %v244_v58, 0.0 }
 0x11d   :  { %v246_v0 = vpop.f32.mrf.mxu0  ;;  %v309_v27 = vrot.slane %v308_v24, 1 }
 0x11e   :  { %v314_v3 = vsel %vm289_vm3, %v283_v61, 0.0 }
 0x11f   :  { %v315_v4 = vadd.f32 %v314_v3, %v313_v63  ;;  %v310_v21 = vadd.f32 %v309_v27, %v308_v24 }
 0x121   :  { %v317_v10 = vadd.f32 %v316_v6, %v315_v4 }
 0x123   :  { %v319_v14 = vadd.f32 %v318_v11, %v317_v10 }
 0x125   :  { %v321_v18 = vadd.f32 %v320_v15, %v319_v14 }
 0x127   :  { %v323_v20 = vadd.f32 %v322_v9, %v321_v18 }
 0x129   :  { %v325_v23 = vadd.f32 %v324_v19, %v323_v20 }
 0x12b   :  { %v326_v13 = vrot.slane %v325_v23, 4 }
 0x12d   :  { %v327_v25 = vadd.f32 %v326_v13, %v325_v23 }
 0x12f   :  { %v328_v26 = vrot.slane %v327_v25, 2 }
 0x131   :  { %v329_v28 = vadd.f32 %v328_v26, %v327_v25 }
 0x133   :  { %v330_v17 = vrot.slane %v329_v28, 1 }
 0x135   :  { %v331_v29 = vadd.f32 %v330_v17, %v329_v28 }
 0x137   :  { %v343_v31 = vsel %vm342_vm4, %v331_v29, %v310_v21 }
 0x138   :  { %592 = vmatmul.mubr.msk.f32.vlgmr.msra.gmra.mxu1 %vm289_vm3, %v343_v31 }
 0x139   :  { %595 = vmatpush3.msra.mxu1 %v426_v30  ;;  %610 = vmatprep.mubr.msk.f32.mxu1 %vm697_vm2, %v696_v1 }
 0x13a   :  { %596 = vmatprep.subr.mxu1 %v696_v1 }
 0x13b   :  { %597 = vmatpush3.msra.mxu1 %v425_v32 }
 0x13c   :  { %598 = vmatprep.subr.mxu1 %v696_v1 }
 0x13d   :  { %599 = vmatpush3.msra.mxu1 %v424_v33 }
 0x13e   :  { %600 = vmatprep.subr.mxu1 %v696_v1 }
 0x13f   :  { %601 = vmatpush3.msra.mxu1 %v423_v34 }
 0x140   :  { %602 = vmatprep.subr.mxu1 %v696_v1 }
 0x141   :  { %603 = vmatpush3.msra.mxu1 %v422_v35 }
 0x142   :  { %604 = vmatprep.subr.mxu1 %v696_v1 }
 0x143   :  { %605 = vmatpush3.msra.mxu1 %v421_v36 }
 0x144   :  { %606 = vmatprep.subr.mxu1 %v696_v1 }
 0x145   :  { %607 = vmatpush3.msra.mxu1 %v420_v37 }
 0x146   :  { %608 = vmatprep.subr.mxu1 %v696_v1 }
 0x147   :  { %609 = vmatpush3.msra.mxu1 %v419_v38 }
 0x1f8   :  { %v412_v39 = vpop.f32.mrf.mxu1 }
 0x1f9   :  { %vm416_vm5 = vcmp.ge.f32.partialorder %v412_v39, 0.0  ;;  %v417_v40 = vmul.f32 0.01, %v412_v39 }
 0x1fa   :  { %v593_v41 = vpop.f32.mrf.mxu1 }
 0x1fb   :  { %v418_v42 = vsel %vm416_vm5, %v412_v39, %v417_v40 }
 0x1fc   :  { %611 = vmatmul.mubr.msk.f32.vlgmr.msra.gmra.mxu1 %vm289_vm3, %v418_v42 }
 0x2bc   :  { %v496_v44 = vpop.f32.mrf.mxu1 }
 0x2bd   :  { %v500_v45 = vand.u32 2147483647, %v496_v44  ;;  %v509_v46 = vmul.f32 %v496_v44, %v496_v44  ;;  %vm506_vm7 = vcmp.ge.f32.partialorder %v496_v44, 0.0 }
 0x2be   :  { %v612_v47 = vpop.f32.mrf.mxu1 }
 0x2bf   :  { %v501_v1 = vsub.f32 0.0, %v500_v45  ;;  %v511_v48 = vsel %vm510_vm6, %v509_v46, 0.0 }
 0x2c0   :  { %512 = vadd.xlane.f32.xlu0 %v511_v48 }
 0x2c1   :  { %v502_v49 = vmul.f32 1.442695, %v501_v1 }
 0x2c3   :  { %668 = vpow2.f32 %v502_v49 }
 0x2d0   :  { %v669_v50 = vpop.eup %668 }
 0x2d1   :  { %v504_v51 = vadd.f32 1.0, %v669_v50 }
 0x2d3   :  { %670 = vrcp.f32 %v504_v51 }
 0x2e0   :  { %v671_v52 = vpop.eup %670 }
 0x2e1   :  { %v507_v53 = vmul.f32 %v671_v52, %v669_v50 }
 0x2e3   :  { %v508_v54 = vsel %vm506_vm7, %v671_v52, %v507_v53 }
 0x2e4   :  { %519 = vperm.xlu0 %667, %v508_v54  }
 0x349   :  { %v513_v55 = vpop.xlane.xlu0 %512 }
 0x34a   :  { %v514_v56 = vadd.f32 1e-12, %v513_v55 }
 0x34c   :  { %672 = vrsqrt.f32 %v514_v56 }
 0x359   :  { %v673_v57 = vpop.eup %672 }
 0x35a   :  { %v516_v58 = vmul.f32 %v673_v57, %v496_v44 }
 0x35f   :  { %v520_v59 = vpop.permute.xlu0 %519 }
 0x360   :  { %v522_v60 = vmul.f32 %v520_v59, %v516_v58 }
 0x362   :  { %523 = vst.msk [vmem:[#allocation2] sm:$0x3] %vm510_vm6, %v522_v60 }
 0x363   :  { %685 = shalt.err (!%p682_p4)
}
 0x364   :  { %533 = dma.vmem_to_hbm [thread:$0]  %s531_s25, 32, %s1069_s4, [#allocation3]  }
 0x365   :  { %694 = dma.done.wait [#allocation3], 32  }
 0x366   :  { %695 = vsyncadd [#allocation3], 4294967264 }
 0x367   :  { %537 = vsyncpa [#allocation3], 1 }

</bundles_post_ra>
